<compile_context>
chip_gen: v7x
topology: tpu7x:2x2x1
jax: 0.10.0
libtpu: 0.0.40
codegen_flags: <defaults>
</compile_context>

<pallas_src>
import functools

import jax
import jax.numpy as jnp
from jax.experimental import pallas as pl
from jax.experimental.pallas import tpu as pltpu


def _round_up(x, n):
    return ((x + n - 1) // n) * n


def _am_softmax_kernel(cos_ref, tgt_ref, loss_ref, *, m, s, epsilon,
                       conf_penalty, label_smooth, assume_cosine):
    cos = cos_ref[...].astype(jnp.float32)               # (TB, C)
    tgt = tgt_ref[...]                                    # (TB, 1) int32
    tb, num_classes = cos.shape

    # one-hot membership via lane-iota compare (the scatter_ equivalent)
    cls_idx = jax.lax.broadcasted_iota(jnp.int32, (tb, num_classes), 1)
    is_tgt = cls_idx == tgt                               # (TB, C) bool

    if assume_cosine:
        # cos in [-1, 1] => phi = s*(cos - m*onehot) <= s, so a constant shift keeps
        # exp() bounded; no per-row max pass / broadcast subtract needed.
        z = s * jnp.where(is_tgt, cos - (1.0 + m), cos - 1.0)
    else:
        # Fallback for unnormalized logits: standard max-shifted softmax.
        phi = s * jnp.where(is_tgt, cos - m, cos)
        z = phi - jnp.max(phi, axis=1, keepdims=True)

    ez = jnp.exp(z)                                       # only full-width transcendental

    # Per-row reductions straight to lane-major (TB,) vectors so the scalar math
    # below is lane-dense and the output store is an unmasked full-lane store.
    s1 = jnp.sum(ez, axis=1)                              # sum e^z
    log_s1 = jnp.log(s1)                                  # shifted log-sum-exp
    z_t = jnp.sum(jnp.where(is_tgt, z, 0.0), axis=1)      # z at the target class

    if label_smooth:
        # sum(-smoothed * log_softmax) with smoothed = (1-eps)*onehot + eps/C
        s3 = jnp.sum(z, axis=1)
        losses = (-(1.0 - epsilon) * (z_t - log_s1)
                  - (epsilon / float(num_classes)) * (s3 - float(num_classes) * log_s1))
    else:
        # plain cross entropy (reduction='none')
        losses = log_s1 - z_t

    if conf_penalty > 0.0:
        # entropy = sum(-p*log p) = logS1 - S2/S1 ; exact reciprocal because the
        # relu zero boundary also drives the nonzero-count denominator (keep f32).
        s2 = jnp.sum(ez * z, axis=1)
        entropy = log_s1 - s2 * pl.reciprocal(s1, approx=False)
        losses = jnp.maximum(losses - conf_penalty * entropy, 0.0)

    loss_ref[0, 0, :] = losses                            # lane-dense (1, 1, TB) store


def am_softmax_loss(cos_theta, target, *, m=0.35, s=30.0, label_smooth=True,
                    epsilon=0.1, conf_penalty=0.3, pr_product=False,
                    assume_cosine=True, block_rows=None):
    """cos_theta: (B, C) float; target: (B,) int. Returns scalar float32 loss."""
    # pr_product rescaling leaves the forward value unchanged (only grads differ).
    del pr_product
    B, C = cos_theta.shape
    itemsize = jnp.dtype(cos_theta.dtype).itemsize
    align = max(8, 32 // itemsize)            # sublane tile per dtype (8 f32 / 16 bf16)

    # Generation-aware VMEM budget: v7x has 64 MiB per TensorCore, v5e/v6e have 128.
    try:
        vmem_cap = int(pltpu.get_tpu_info().vmem_capacity_bytes)
    except Exception:
        vmem_cap = 64 * 1024 * 1024           # conservative default (v7x-sized)
    if vmem_cap >= 100 * 1024 * 1024:
        vmem_limit = 96 * 1024 * 1024         # v5e / v6e
        tile_bytes = 8 * 1024 * 1024
    else:
        vmem_limit = 48 * 1024 * 1024         # v7x
        tile_bytes = 4 * 1024 * 1024

    if block_rows is None:
        # ~4-8 MiB of input per tile (per grid-step overhead is ~0.35us; large tiles
        # keep the DMA at >90% of HBM roofline).  The in-kernel live set is a few
        # (TB, C) f32 temporaries, which stays inside the per-generation limit above.
        tb = tile_bytes // max(1, C * itemsize)
        tb = max(align, min(tb, 4096))
    else:
        tb = max(int(block_rows), align)
    tb = _round_up(tb, align)
    if B > align:
        # Keep >= 2 tiles when the batch allows it so the "parallel" grid axis can
        # shard across both v7x TensorCores.
        tb = min(tb, _round_up(pl.cdiv(B, 2), align))
    tb = min(tb, _round_up(B, align))
    num_tiles = pl.cdiv(B, tb)

    # No HBM padding copy of cos_theta: the grid over-covers B and the ragged last
    # tile's out-of-range rows produce garbage that is sliced off below.
    tgt2d = target.astype(jnp.int32).reshape(B, 1)

    kernel = functools.partial(
        _am_softmax_kernel, m=float(m), s=float(s), epsilon=float(epsilon),
        conf_penalty=float(conf_penalty), label_smooth=bool(label_smooth),
        assume_cosine=bool(assume_cosine))

    # TODO(synk): for very large class counts (C >= ~16-32K) stream over C in lane
    # chunks with (TB,) accumulators instead of full-width temporaries; optionally
    # keep the compare/select/scale in bf16 on v6e/v7x (exp/reductions stay f32).
    per_row = pl.pallas_call(
        kernel,
        out_shape=jax.ShapeDtypeStruct((num_tiles, 1, tb), jnp.float32),
        grid=(num_tiles,),
        in_specs=[
            pl.BlockSpec((tb, C), lambda i: (i, 0)),
            pl.BlockSpec((tb, 1), lambda i: (i, 0)),
        ],
        out_specs=pl.BlockSpec((1, 1, tb), lambda i: (i, 0, 0)),
        compiler_params=pltpu.CompilerParams(
            dimension_semantics=("parallel",),        # tiles are independent
            vmem_limit_bytes=vmem_limit),
    )(cos_theta, tgt2d)

    losses = per_row.reshape(-1)[:B]
    # PyTorch: losses.sum() / max(losses.nonzero().size(0), 1)
    nonzero = jnp.maximum(jnp.sum((losses != 0.0).astype(jnp.float32)), 1.0)
    return jnp.sum(losses) / nonzero


def _reference(cos_theta, target, *, m=0.35, s=30.0, label_smooth=True,
               epsilon=0.1, conf_penalty=0.3):
    """Pure-JAX reference mirroring the PyTorch forward."""
    B, C = cos_theta.shape
    one_hot = jax.nn.one_hot(target, C, dtype=jnp.float32)
    phi = s * (cos_theta.astype(jnp.float32) - m * one_hot)
    log_probs = jax.nn.log_softmax(phi, axis=1)
    if label_smooth:
        smoothed = (1.0 - epsilon) * one_hot + epsilon / C
        losses = jnp.sum(-smoothed * log_probs, axis=1)
    else:
        losses = jnp.sum(-one_hot * log_probs, axis=1)
    if conf_penalty > 0.0:
        probs = jax.nn.softmax(phi, axis=1)
        entropy = jnp.sum(-probs * log_probs, axis=1)
        losses = jnp.maximum(losses - conf_penalty * entropy, 0.0)
    nz = jnp.maximum(jnp.sum(losses != 0.0), 1)
    return jnp.sum(losses) / nz


if __name__ == "__main__":
    key = jax.random.PRNGKey(0)
    k1, k2, k3, k4 = jax.random.split(key, 4)

    # Case 1: small single-tile shape, default settings.
    B, C = 8, 128
    cos1 = jax.random.uniform(k1, (B, C), dtype=jnp.float32, minval=-1.0, maxval=1.0)
    tgt1 = jax.random.randint(k2, (B,), 0, C, dtype=jnp.int32)
    out1 = jax.block_until_ready(am_softmax_loss(cos1, tgt1))
    ref1 = jax.block_until_ready(_reference(cos1, tgt1))
    assert jnp.allclose(out1, ref1, rtol=1e-5, atol=1e-5), (out1, ref1)

    # Case 2: multi-tile grid with a ragged last tile (B % tb != 0), no HBM padding.
    B2, C2 = 20, 256
    cos2 = jax.random.uniform(k3, (B2, C2), dtype=jnp.float32, minval=-1.0, maxval=1.0)
    tgt2 = jax.random.randint(k4, (B2,), 0, C2, dtype=jnp.int32)
    out2 = jax.block_until_ready(am_softmax_loss(cos2, tgt2, block_rows=8))
    ref2 = jax.block_until_ready(_reference(cos2, tgt2))
    assert jnp.allclose(out2, ref2, rtol=1e-5, atol=1e-5), (out2, ref2)

    # Case 3: label_smooth=False branch (plain CE + confidence penalty).
    out3 = jax.block_until_ready(
        am_softmax_loss(cos2, tgt2, label_smooth=False, block_rows=8))
    ref3 = jax.block_until_ready(_reference(cos2, tgt2, label_smooth=False))
    assert jnp.allclose(out3, ref3, rtol=1e-5, atol=1e-5), (out3, ref3)

    # Case 4: fallback path with the per-row max pass (unnormalized inputs allowed).
    out4 = jax.block_until_ready(
        am_softmax_loss(cos2, tgt2, assume_cosine=False, block_rows=8))
    assert jnp.allclose(out4, ref2, rtol=1e-5, atol=1e-5), (out4, ref2)

    # Case 5: bf16 input passes straight through (kernel upcasts in VMEM).
    cos_bf = cos2.astype(jnp.bfloat16)
    out5 = jax.block_until_ready(am_softmax_loss(cos_bf, tgt2, block_rows=8))
    ref5 = jax.block_until_ready(_reference(cos_bf.astype(jnp.float32), tgt2))
    assert jnp.allclose(out5, ref5, rtol=1e-4, atol=1e-4), (out5, ref5)

    print("KERNEL_OK")
</pallas_src>

<mosaic_0001>
module attributes {stable_mosaic.version = 11 : i64} {
  func.func @_am_softmax_kernel(%arg0: i32, %arg1: memref<8x128xf32, #tpu.memory_space<vmem>>, %arg2: memref<8x1xi32, #tpu.memory_space<vmem>>, %arg3: memref<1x1x8xf32, #tpu.memory_space<vmem>>) attributes {dimension_semantics = [#tpu.dimension_semantics<parallel>], iteration_bounds = array<i64: 1>, scalar_prefetch = 0 : i64, scratch_operands = 0 : i64, tpu.core_type = #tpu.core_type<tc>, window_params = [{transform_indices = @transform_0, window_bounds = array<i64: 8, 128>}, {transform_indices = @transform_1, window_bounds = array<i64: 8, 1>}, {transform_indices = @transform_2, window_bounds = array<i64: 1, 1, 8>}]} {
    %c0 = arith.constant 0 : index
    %c0_0 = arith.constant 0 : index
    %0 = vector.load %arg1[%c0, %c0_0] : memref<8x128xf32, #tpu.memory_space<vmem>>, vector<8x128xf32>
    %c0_1 = arith.constant 0 : index
    %c0_2 = arith.constant 0 : index
    %1 = vector.load %arg2[%c0_1, %c0_2] : memref<8x1xi32, #tpu.memory_space<vmem>>, vector<8x1xi32>
    %2 = tpu.iota {dimensions = array<i32: 1>} : vector<8x128xi32>
    %3 = vector.broadcast %1 : vector<8x1xi32> to vector<8x128xi32>
    %4 = arith.cmpi eq, %2, %3 : vector<8x128xi32>
    %cst = arith.constant 1.350000e+00 : f32
    %5 = vector.broadcast %cst : f32 to vector<8x128xf32>
    %6 = arith.subf %0, %5 : vector<8x128xf32>
    %cst_3 = arith.constant 1.000000e+00 : f32
    %7 = vector.broadcast %cst_3 : f32 to vector<8x128xf32>
    %8 = arith.subf %0, %7 : vector<8x128xf32>
    %9 = arith.select %4, %6, %8 : vector<8x128xi1>, vector<8x128xf32>
    %cst_4 = arith.constant 3.000000e+01 : f32
    %10 = vector.broadcast %cst_4 : f32 to vector<8x128xf32>
    %11 = arith.mulf %10, %9 : vector<8x128xf32>
    %12 = math.exp %11 : vector<8x128xf32>
    %cst_5 = arith.constant dense<0.000000e+00> : vector<8xf32>
    %13 = vector.multi_reduction <add>, %12, %cst_5 [1] : vector<8x128xf32> to vector<8xf32>
    %14 = math.log %13 : vector<8xf32>
    %cst_6 = arith.constant 0.000000e+00 : f32
    %15 = vector.broadcast %cst_6 : f32 to vector<8x128xf32>
    %16 = arith.select %4, %11, %15 : vector<8x128xi1>, vector<8x128xf32>
    %cst_7 = arith.constant dense<0.000000e+00> : vector<8xf32>
    %17 = vector.multi_reduction <add>, %16, %cst_7 [1] : vector<8x128xf32> to vector<8xf32>
    %cst_8 = arith.constant dense<0.000000e+00> : vector<8xf32>
    %18 = vector.multi_reduction <add>, %11, %cst_8 [1] : vector<8x128xf32> to vector<8xf32>
    %19 = arith.subf %17, %14 : vector<8xf32>
    %cst_9 = arith.constant -0.899999976 : f32
    %20 = vector.broadcast %cst_9 : f32 to vector<8xf32>
    %21 = arith.mulf %20, %19 : vector<8xf32>
    %cst_10 = arith.constant 1.280000e+02 : f32
    %22 = vector.broadcast %cst_10 : f32 to vector<8xf32>
    %23 = arith.mulf %22, %14 : vector<8xf32>
    %24 = arith.subf %18, %23 : vector<8xf32>
    %cst_11 = arith.constant 7.812500e-04 : f32
    %25 = vector.broadcast %cst_11 : f32 to vector<8xf32>
    %26 = arith.mulf %25, %24 : vector<8xf32>
    %27 = arith.subf %21, %26 : vector<8xf32>
    %28 = arith.mulf %12, %11 : vector<8x128xf32>
    %cst_12 = arith.constant dense<0.000000e+00> : vector<8xf32>
    %29 = vector.multi_reduction <add>, %28, %cst_12 [1] : vector<8x128xf32> to vector<8xf32>
    %30 = tpu.reciprocal %13 : vector<8xf32> -> vector<8xf32>
    %31 = arith.mulf %29, %30 : vector<8xf32>
    %32 = arith.subf %14, %31 : vector<8xf32>
    %cst_13 = arith.constant 3.000000e-01 : f32
    %33 = vector.broadcast %cst_13 : f32 to vector<8xf32>
    %34 = arith.mulf %33, %32 : vector<8xf32>
    %35 = arith.subf %27, %34 : vector<8xf32>
    %cst_14 = arith.constant 0.000000e+00 : f32
    %36 = vector.broadcast %cst_14 : f32 to vector<8xf32>
    %37 = arith.maximumf %35, %36 : vector<8xf32>
    %c0_15 = arith.constant 0 : index
    %c0_16 = arith.constant 0 : index
    %c0_17 = arith.constant 0 : index
    %38 = vector.load %arg3[%c0_15, %c0_16, %c0_17] : memref<1x1x8xf32, #tpu.memory_space<vmem>>, vector<1x1x8xf32>
    %39 = vector.shape_cast %38 : vector<1x1x8xf32> to vector<8xf32>
    %40 = vector.shape_cast %37 : vector<8xf32> to vector<1x1x8xf32>
    tpu.vector_store %arg3[%c0_15, %c0_16, %c0_17], %40 {strides = array<i32>} : memref<1x1x8xf32, #tpu.memory_space<vmem>>, vector<1x1x8xf32>,
    return
  }
  func.func @transform_0(%arg0: i32) -> (i32, i32) {
    %c0_i32 = arith.constant 0 : i32
    %c0_i32_0 = arith.constant 0 : i32
    return %arg0, %c0_i32 : i32, i32
  }
  func.func @transform_1(%arg0: i32) -> (i32, i32) {
    %c0_i32 = arith.constant 0 : i32
    %c0_i32_0 = arith.constant 0 : i32
    return %arg0, %c0_i32 : i32, i32
  }
  func.func @transform_2(%arg0: i32) -> (i32, i32, i32) {
    %c0_i32 = arith.constant 0 : i32
    %c0_i32_0 = arith.constant 0 : i32
    %c0_i32_1 = arith.constant 0 : i32
    return %arg0, %c0_i32, %c0_i32_0 : i32, i32, i32
  }
}

</mosaic_0001>

<bundles_post_ra>
// kernel: tpu_custom_call.1
= control target key start
LH: loop header
LB: loop body
LE: loop exit
PB: predicated region body
PF: predicated region fallthrough
CT: control target
= control target key end

     0   :  { %s142_s0 = inlined_call_operand.vmem [shape: f32[8,128], index: 0, kind: input, shape index: {}]   ;;  %s143_s1 = inlined_call_operand.vmem [shape: s32[8,1], index: 1, kind: input, shape index: {}]   ;;  %s144_s2 = inlined_call_operand.hbm [shape: f32[1,1,8], index: 2, kind: output, shape index: {}]  }
   0x1   :  { %v13_v0 = vld [vmem:[%s143_s1] sm:$0xff] }
   0x2   :  { %7 = vsyncpa [#allocation3], 0  ;;  %v107_v1 = vmov 0   ;;  %v14_v2 = vlaneseq  ;;  %v12_v3 = vld [vmem:[%s142_s0] sm:$0xff]  ;;  %s108_s0 = smov [#allocation2]   ;;  %vm56_vm1 = vcmask 57344  }
   0x3   :  { %76 = vset.pattern.permute.xlu0 %v107_v1  ;;  %v72_v5 = vadd.f32 -1.35, %v12_v3  ;;  %v73_v6 = vadd.f32 -1.0, %v12_v3  ;;  %s64_s1 = sshll.u32 %s108_s0, 4  ;;  %s65_s1 = int_to_ptr.vmem [resolvable:$true] %s64_s1 }
   0x4   :  { %17 = vperm.xlu0 %76, %v13_v0   ;;  %v15_v4 = vand.u32 127, %v14_v2  ;;  %v52_v26 = vshrl.u32 %v14_v2, 7  ;;  %s83_s13 = scalar_lea.vmem %s65_s1, 16  ;;  %s87_s14 = scalar_lea.vmem %s65_s1, 32 }
   0x5   :  { %p84_p0 = scmp.ne.s32.totalorder %s65_s1, %s83_s13  ;;  %p88_p1 = scmp.lt.s32.totalorder %s65_s1, %s65_s1 }
   0x6   :  { %v53_v31 = vsub.s32 %v15_v4, %v52_v26  ;;  %p89_p2 = scmp.lt.s32.totalorder %s87_s14, %s83_s13 }
   0x8   :  { %p90_p3 = por %p89_p2, %p88_p1 }
   0xa   :  { %p91_p4 = pnand %p90_p3, %p84_p0 }
  0x83   :  { %v18_v7 = vpop.permute.xlu0 %17 }
  0x84   :  { %vm19_vm0 = vcmp.eq.s32.totalorder %v15_v4, %v18_v7 }
  0x85   :  { %v22_v8 = vsel %vm19_vm0, %v72_v5, %v73_v6 }
  0x86   :  { %v23_v9 = vmul.f32 30.0, %v22_v8 }
  0x88   :  { %v30_v10 = vsel %vm19_vm0, %v23_v9, 0.0  ;;  %v24_v11 = vmul.f32 1.442695, %v23_v9 }
  0x89   :  { %31 = vadd.xlane.f32.xlu1 %v30_v10 }
  0x8a   :  { %77 = vpow2.f32 %v24_v11 }
  0x8d   :  { %33 = vadd.xlane.f32.xlu1 %v23_v9 }
  0x94   :  { %v78_v12 = vpop.eup %77 }
  0x95   :  { %26 = vadd.xlane.f32.xlu0 %v78_v12  ;;  %v41_v13 = vmul.f32 %v78_v12, %v23_v9 }
  0x97   :  { %42 = vadd.xlane.f32.xlu1 %v41_v13 }
 0x116   :  { %v32_v15 = vpop.xlane.xlu1 %31 }
 0x11a   :  { %v34_v16 = vpop.xlane.xlu1 %33 }
 0x122   :  { %v27_v14 = vpop.xlane.xlu0 %26 }
 0x123   :  { %79 = vlog2.f32 %v27_v14 }
 0x124   :  { %81 = vrcp.f32 %v27_v14  ;;  %v43_v20 = vpop.xlane.xlu1 %42 }
 0x12d   :  { %v80_v17 = vpop.eup %79 }
 0x12e   :  { %v82_v18 = vpop.eup %81  ;;  %v29_v19 = vmul.f32 0.6931472, %v80_v17 }
 0x12f   :  { %v45_v21 = vmul.f32 %v82_v18, %v43_v20 }
 0x130   :  { %v35_v22 = vsub.f32 %v32_v15, %v29_v19  ;;  %v37_v23 = vmul.f32 128.0, %v29_v19 }
 0x131   :  { %v46_v25 = vsub.f32 %v29_v19, %v45_v21 }
 0x132   :  { %v38_v24 = vsub.f32 %v34_v16, %v37_v23  ;;  %v36_v27 = vmul.f32 -0.9, %v35_v22 }
 0x133   :  { %v47_v30 = vmul.f32 0.3, %v46_v25 }
 0x134   :  { %v39_v28 = vmul.f32 0.00078125, %v38_v24 }
 0x136   :  { %v40_v29 = vsub.f32 %v36_v27, %v39_v28 }
 0x138   :  { %v48_v32 = vsub.f32 %v40_v29, %v47_v30 }
 0x13a   :  { %v49_v33 = vmax.f32 %v48_v32, 0.0 }
 0x13c   :  { %v54_v34 = vrot.slane %v49_v33, %v53_v31 }
 0x13e   :  { %57 = vst.msk [vmem:[#allocation2] sm:$0x1] %vm56_vm1, %v54_v34 }
 0x13f   :  { %94 = shalt.err (!%p91_p4)
}
 0x140   :  { %s95_s17 = scalar_lea.hbm %s144_s2, 16 }
 0x141   :  { %p96_p5 = scmp.ne.s32.totalorder %s144_s2, %s95_s17  ;;  %p99_p6 = scmp.lt.u32.totalorder %s95_s17, %s144_s2 }
 0x143   :  { %p101_p7 = pnand %p99_p6, %p96_p5 }
 0x145   :  { %104 = shalt.err (!%p101_p7)
}
 0x146   :  { %67 = dma.vmem_to_hbm [thread:$0]  %s65_s1, 16, %s144_s2, [#allocation3]  }
 0x147   :  { %105 = dma.done.wait [#allocation3], 16  }
 0x148   :  { %106 = vsyncadd [#allocation3], 4294967280 }
 0x149   :  { %71 = vsyncpa [#allocation3], 1 }

</bundles_post_ra>
